<compile_context>
chip_gen: v6e
topology: v6e:2x2x1
jax: 0.10.0
libtpu: 0.0.40
codegen_flags: <defaults>
</compile_context>

<pallas_src>
import jax
import jax.numpy as jnp
from jax.experimental import pallas as pl
from jax.experimental.pallas import tpu as pltpu

_LANES = 128
_SUBLANES = 8
# Double-buffered working set target (x stream + lane-padded output blocks).
_VMEM_WORKING_SET = 16 * 1024 * 1024
# Scoped-VMEM request: above v5e's 16 MiB default, well under v7x's 64 MiB phys.
_VMEM_LIMIT = 32 * 1024 * 1024


def _round_up(n: int, m: int) -> int:
    return (n + m - 1) // m * m


def _cdiv(n: int, m: int) -> int:
    return (n + m - 1) // m


def _stable_sigmoid(z):
    # sigmoid(z) = 1/(1+exp(-z)), computed via exp(-|z|) so the EUP exp never
    # overflows, with an exact divide (kernel is HBM-bound, the extra EUP/VALU
    # work is hidden under the x DMA).
    ez = jnp.exp(-jnp.abs(z))
    p = ez / (1.0 + ez)
    return jnp.where(z >= 0, 1.0 - p, p)


def _cost(batch: int, dim: int, itemsize: int) -> pl.CostEstimate:
    return pl.CostEstimate(
        flops=2 * batch * dim + 4 * batch,      # matvec + bias/sigmoid arith
        transcendentals=batch,                  # one exp per sample
        bytes_accessed=batch * dim * itemsize + batch * 4 + dim * 4,
    )


# ---------------------------------------------------------------------------
# Packed path: D divides 128 (the Iris case, D = 4).
# ---------------------------------------------------------------------------
def _packed_kernel(b_ref, x_ref, w2_ref, o_ref):
    # b_ref : (1,)       f32 in SMEM (scalar prefetch)
    # x_ref : (TM, 128)  native dtype -- 128//D samples per lane-dense row
    # w2_ref: (128, G)   f32 segment-sum weight matrix, VMEM resident
    # o_ref : (TM, G)    f32 probabilities (contiguous HBM writeback)
    x = x_ref[...].astype(jnp.float32)              # in-kernel cast, hidden by DMA
    logits = jnp.dot(x, w2_ref[...], preferred_element_type=jnp.float32) + b_ref[0]
    o_ref[...] = _stable_sigmoid(logits)


def _logreg_packed(x, weight, bias, batch, dim):
    g = _LANES // dim                               # samples per packed row
    itemsize = jnp.dtype(x.dtype).itemsize

    # Reinterpret the row-major (B, D) buffer as (rows, 128).  This is a free
    # bitcast-reshape when B*D is already 128-aligned; otherwise one small pad
    # copy (only for ragged/tiny batches).
    rows = max(_cdiv(batch * dim, _LANES), _SUBLANES)
    flat = x.reshape(-1)
    if rows * _LANES != batch * dim:
        flat = jnp.pad(flat, (0, rows * _LANES - batch * dim))
    x_packed = flat.reshape(rows, _LANES)

    # Segment-sum weight matrix: W2[gi*D + d, gi] = w[d].  Folds the per-feature
    # multiply and the intra-group lane reduction into one tiny resident operand.
    w2 = jnp.kron(jnp.eye(g, dtype=jnp.float32), weight.reshape(dim, 1))

    # Tile rows of x_packed.  Budget against the *padded* VMEM footprint:
    # 2*TM*128*itemsize (x double buffer) + 2*TM*128*4 (output blocks are
    # lane-padded to 128 lanes in VMEM even though only G lanes are used).
    tm_cap = max(
        _SUBLANES,
        _VMEM_WORKING_SET // (2 * _LANES * (itemsize + 4)) // _SUBLANES * _SUBLANES,
    )
    # >= 2 grid steps when there is enough data: overlaps DMA with compute and
    # lets the "parallel" axis shard across both v7x TensorCores.
    tm = min(tm_cap, max(_SUBLANES, _round_up(_cdiv(rows, 2), _SUBLANES)))
    n_tiles = _cdiv(rows, tm)

    out = pl.pallas_call(
        _packed_kernel,
        out_shape=jax.ShapeDtypeStruct((rows, g), jnp.float32),
        grid_spec=pltpu.PrefetchScalarGridSpec(
            num_scalar_prefetch=1,                          # bias rides in SMEM
            grid=(n_tiles,),                                # pipelined x stream
            in_specs=[
                pl.BlockSpec((tm, _LANES), lambda i, b: (i, 0)),   # stream x
                pl.BlockSpec((_LANES, g), lambda i, b: (0, 0)),    # resident W2
            ],
            out_specs=pl.BlockSpec((tm, g), lambda i, b: (i, 0)),
        ),
        compiler_params=pltpu.CompilerParams(
            dimension_semantics=("parallel",),
            vmem_limit_bytes=_VMEM_LIMIT,
        ),
        cost_estimate=_cost(batch, dim, itemsize),
    )(bias, x_packed, w2)

    # Samples are stored in row-major order: reshape is a free bitcast and the
    # trailing slice only touches the tiny (B, 1) output.
    return out.reshape(-1, 1)[:batch]


# ---------------------------------------------------------------------------
# Row-wise fallback: arbitrary D (not dividing 128).
# ---------------------------------------------------------------------------
def _rowwise_kernel(b_ref, x_ref, w_ref, o_ref):
    # x_ref: (TB, D) native dtype, w_ref: (1, D) f32 resident, o_ref: (TB, 1) f32
    x = x_ref[...].astype(jnp.float32)
    # Transpose-free mat-vec: broadcast multiply (VPU) + lane reduce (XLU).
    logits = jnp.sum(x * w_ref[...], axis=-1, keepdims=True) + b_ref[0]
    o_ref[...] = _stable_sigmoid(logits)


def _logreg_rowwise(x, weight, bias, batch, dim):
    itemsize = jnp.dtype(x.dtype).itemsize
    d_pad = _round_up(dim, _LANES)                  # lane-padded row footprint
    # Budget uses padded footprints: x double buffer + padded (TB,1) out blocks.
    per_row = d_pad * itemsize + _LANES * 4
    tb_cap = max(
        _SUBLANES,
        _VMEM_WORKING_SET // (2 * per_row) // _SUBLANES * _SUBLANES,
    )
    if batch <= _SUBLANES:
        tb = batch                                   # exact single block
    else:
        tb = min(tb_cap, max(_SUBLANES, _round_up(_cdiv(batch, 2), _SUBLANES)))
    n_tiles = _cdiv(batch, tb)                       # ragged edge handled by Pallas

    # TODO(synk): for very large D add a second "arbitrary" reduction grid axis
    # over D with a (TB, 1) f32 scratch accumulator, and a lane-dense output
    # layout as in the packed path; unnecessary for Iris (D = 4 -> packed path).
    return pl.pallas_call(
        _rowwise_kernel,
        out_shape=jax.ShapeDtypeStruct((batch, 1), jnp.float32),
        grid_spec=pltpu.PrefetchScalarGridSpec(
            num_scalar_prefetch=1,
            grid=(n_tiles,),
            in_specs=[
                pl.BlockSpec((tb, dim), lambda i, b: (i, 0)),      # stream x
                pl.BlockSpec((1, dim), lambda i, b: (0, 0)),       # resident w
            ],
            out_specs=pl.BlockSpec((tb, 1), lambda i, b: (i, 0)),
        ),
        compiler_params=pltpu.CompilerParams(
            dimension_semantics=("parallel",),
            vmem_limit_bytes=_VMEM_LIMIT,
        ),
        cost_estimate=_cost(batch, dim, itemsize),
    )(bias, x, weight)


@jax.jit
def logistic_regression(x, weight, bias):
    """x: (B, D); weight: (1, D); bias: (1,) -> sigmoid(x @ weight.T + bias): (B, 1) f32."""
    batch, dim = x.shape
    weight = weight.astype(jnp.float32)              # tiny; x itself stays native
    bias = bias.reshape(-1).astype(jnp.float32)
    if dim <= _LANES and _LANES % dim == 0:
        return _logreg_packed(x, weight, bias, batch, dim)
    return _logreg_rowwise(x, weight, bias, batch, dim)


def _reference(x, weight, bias):
    return jax.nn.sigmoid(
        x.astype(jnp.float32) @ weight.astype(jnp.float32).T
        + bias.astype(jnp.float32)[None, :]
    )


if __name__ == "__main__":
    key = jax.random.PRNGKey(0)
    kx, kw, kb, kx2, kx3 = jax.random.split(key, 5)

    input_dim = 4                                    # Iris has 4 features
    # Deterministic init mimicking nn.Linear(input_dim, 1):
    # uniform(-1/sqrt(in), 1/sqrt(in)) for both weight and bias.
    bound = 1.0 / jnp.sqrt(jnp.float32(input_dim))
    weight = jax.random.uniform(kw, (1, input_dim), jnp.float32, -bound, bound)
    bias = jax.random.uniform(kb, (1,), jnp.float32, -bound, bound)

    # Small Iris-style batch (packed path, single tile).
    x = jax.random.normal(kx, (8, input_dim), dtype=jnp.float32)
    out = logistic_regression(x, weight, bias)
    jax.block_until_ready(out)
    assert out.shape == (8, 1)
    assert jnp.allclose(out, _reference(x, weight, bias), atol=2e-3, rtol=2e-3)

    # Larger ragged batch (packed path, 2 grid steps + masked ragged edge block).
    x2 = jax.random.normal(kx2, (300, input_dim), dtype=jnp.float32)
    out2 = logistic_regression(x2, weight, bias)
    jax.block_until_ready(out2)
    assert out2.shape == (300, 1)
    assert jnp.allclose(out2, _reference(x2, weight, bias), atol=2e-3, rtol=2e-3)

    # Feature count that does not divide 128 exercises the row-wise fallback.
    d3 = 10
    w3 = jax.random.uniform(kw, (1, d3), jnp.float32, -bound, bound)
    x3 = jax.random.normal(kx3, (20, d3), dtype=jnp.float32)
    out3 = logistic_regression(x3, w3, bias)
    jax.block_until_ready(out3)
    assert out3.shape == (20, 1)
    assert jnp.allclose(out3, _reference(x3, w3, bias), atol=2e-3, rtol=2e-3)

    print("KERNEL_OK")
</pallas_src>

<mosaic_0001>
module attributes {stable_mosaic.version = 11 : i64} {
  func.func @_packed_kernel(%arg0: i32, %arg1: memref<1xf32, #tpu.memory_space<smem>>, %arg2: memref<8x128xf32, #tpu.memory_space<vmem>>, %arg3: memref<128x32xf32, #tpu.memory_space<vmem>>, %arg4: memref<8x32xf32, #tpu.memory_space<vmem>>) attributes {dimension_semantics = [#tpu.dimension_semantics<parallel>], iteration_bounds = array<i64: 1>, scalar_prefetch = 1 : i64, scratch_operands = 0 : i64, tpu.core_type = #tpu.core_type<tc>, window_params = [{transform_indices = @transform_0, window_bounds = array<i64: 8, 128>}, {pipeline_mode = #tpu.pipeline_mode<synchronous>, transform_indices = @transform_1, window_bounds = array<i64: 128, 32>}, {transform_indices = @transform_2, window_bounds = array<i64: 8, 32>}]} {
    %c0 = arith.constant 0 : index
    %c0_0 = arith.constant 0 : index
    %0 = vector.load %arg2[%c0, %c0_0] : memref<8x128xf32, #tpu.memory_space<vmem>>, vector<8x128xf32>
    %c0_1 = arith.constant 0 : index
    %c0_2 = arith.constant 0 : index
    %1 = vector.load %arg3[%c0_1, %c0_2] : memref<128x32xf32, #tpu.memory_space<vmem>>, vector<128x32xf32>
    %cst = arith.constant dense<0.000000e+00> : vector<8x32xf32>
    %2 = tpu.matmul %0, %1, %cst {dimension_numbers = #tpu.dot_dimension_numbers<[1], [0], [0], [1], [0, 0, 1, 1], [], []>} : vector<8x128xf32>, vector<128x32xf32>, vector<8x32xf32> -> vector<8x32xf32>
    %c0_3 = arith.constant 0 : index
    %3 = memref.load %arg1[%c0_3] : memref<1xf32, #tpu.memory_space<smem>>
    %4 = vector.broadcast %3 : f32 to vector<8x32xf32>
    %5 = arith.addf %2, %4 : vector<8x32xf32>
    %6 = math.absf %5 : vector<8x32xf32>
    %cst_4 = arith.constant 0.000000e+00 : f32
    %7 = vector.broadcast %cst_4 : f32 to vector<8x32xf32>
    %8 = arith.subf %7, %6 : vector<8x32xf32>
    %9 = math.exp %8 : vector<8x32xf32>
    %cst_5 = arith.constant 1.000000e+00 : f32
    %10 = vector.broadcast %cst_5 : f32 to vector<8x32xf32>
    %11 = arith.addf %10, %9 : vector<8x32xf32>
    %12 = arith.divf %9, %11 : vector<8x32xf32>
    %cst_6 = arith.constant 0.000000e+00 : f32
    %13 = vector.broadcast %cst_6 : f32 to vector<8x32xf32>
    %14 = arith.cmpf oge, %5, %13 : vector<8x32xf32>
    %cst_7 = arith.constant 1.000000e+00 : f32
    %15 = vector.broadcast %cst_7 : f32 to vector<8x32xf32>
    %16 = arith.subf %15, %12 : vector<8x32xf32>
    %17 = arith.select %14, %16, %12 : vector<8x32xi1>, vector<8x32xf32>
    %c0_8 = arith.constant 0 : index
    %c0_9 = arith.constant 0 : index
    %18 = vector.load %arg4[%c0_8, %c0_9] : memref<8x32xf32, #tpu.memory_space<vmem>>, vector<8x32xf32>
    tpu.vector_store %arg4[%c0_8, %c0_9], %17 {strides = array<i32>} : memref<8x32xf32, #tpu.memory_space<vmem>>, vector<8x32xf32>,
    return
  }
  func.func @transform_0(%arg0: i32, %arg1: memref<1xf32, #tpu.memory_space<smem>>) -> (i32, i32) {
    %c0_i32 = arith.constant 0 : i32
    %c0_i32_0 = arith.constant 0 : i32
    return %arg0, %c0_i32 : i32, i32
  }
  func.func @transform_1(%arg0: i32, %arg1: memref<1xf32, #tpu.memory_space<smem>>) -> (i32, i32) {
    %c0_i32 = arith.constant 0 : i32
    %c0_i32_0 = arith.constant 0 : i32
    %c0_i32_1 = arith.constant 0 : i32
    return %c0_i32, %c0_i32_0 : i32, i32
  }
  func.func @transform_2(%arg0: i32, %arg1: memref<1xf32, #tpu.memory_space<smem>>) -> (i32, i32) {
    %c0_i32 = arith.constant 0 : i32
    %c0_i32_0 = arith.constant 0 : i32
    return %arg0, %c0_i32 : i32, i32
  }
}

</mosaic_0001>

<bundles_post_ra>
// kernel: logistic_regression.1
= control target key start
LH: loop header
LB: loop body
LE: loop exit
PB: predicated region body
PF: predicated region fallthrough
CT: control target
= control target key end

     0   :  { %v176_v0 = vmov 0.0   ;;  %vm177_vm0 = vmmov 0   ;;  %vm112_vm1 = vcmask 261120   ;;  %s255_s2 = inlined_call_operand.vmem [shape: f32[128,32], index: 2, kind: input, shape index: {}]   ;;  %s256_s1 = inlined_call_operand.vmem [shape: f32[8,128], index: 1, kind: input, shape index: {}]   ;;  %s257_s0 = inlined_call_operand.<no memory space> [shape: f32[1], index: 0, kind: input, shape index: {}]   ;;  %s258_s3 = inlined_call_operand.vmem [shape: f32[8,32], index: 3, kind: output, shape index: {}]  }
   0x1   :  { %135 = vmatprep.subr.mxu0 %v176_v0  ;;  %v29_v1 = vld [vmem:[%s255_s2 + $0x78] sm:$0xff]  ;;  %v28_v2 = vld [vmem:[%s255_s2 + $0x70] sm:$0xff]  ;;  %167 = vmatprep.mubr.msk.f32.mxu0 %vm177_vm0, %v176_v0  ;;  %v27_v3 = vld [vmem:[%s255_s2 + $0x68] sm:$0xff]  ;;  %v31_v18 = vstv %s257_s0 }
   0x2   :  { %136 = vmatpush3.msra.mxu0 %v29_v1  ;;  %v26_v4 = vld [vmem:[%s255_s2 + $0x60] sm:$0xff]  ;;  %v25_v5 = vld [vmem:[%s255_s2 + $0x58] sm:$0xff]  ;;  %v24_v6 = vld [vmem:[%s255_s2 + $0x50] sm:$0xff] }
   0x3   :  { %137 = vmatprep.subr.mxu0 %v176_v0  ;;  %v23_v7 = vld [vmem:[%s255_s2 + $0x48] sm:$0xff]  ;;  %v22_v8 = vld [vmem:[%s255_s2 + $0x40] sm:$0xff]  ;;  %v21_v9 = vld [vmem:[%s255_s2 + $0x38] sm:$0xff] }
   0x4   :  { %138 = vmatpush3.msra.mxu0 %v28_v2  ;;  %v20_v10 = vld [vmem:[%s255_s2 + $0x30] sm:$0xff]  ;;  %v19_v11 = vld [vmem:[%s255_s2 + $0x28] sm:$0xff]  ;;  %v18_v12 = vld [vmem:[%s255_s2 + $0x20] sm:$0xff] }
   0x5   :  { %139 = vmatprep.subr.mxu0 %v176_v0  ;;  %v17_v13 = vld [vmem:[%s255_s2 + $0x18] sm:$0xff]  ;;  %v16_v14 = vld [vmem:[%s255_s2 + $0x10] sm:$0xff]  ;;  %v15_v15 = vld [vmem:[%s255_s2 + $0x8] sm:$0xff] }
   0x6   :  { %140 = vmatpush3.msra.mxu0 %v27_v3  ;;  %v14_v16 = vld [vmem:[%s255_s2] sm:$0xff] }
   0x7   :  { %141 = vmatprep.subr.mxu0 %v176_v0  ;;  %v13_v17 = vld [vmem:[%s256_s1] sm:$0xff] }
   0x8   :  { %142 = vmatpush3.msra.mxu0 %v26_v4 }
   0x9   :  { %143 = vmatprep.subr.mxu0 %v176_v0 }
   0xa   :  { %144 = vmatpush3.msra.mxu0 %v25_v5 }
   0xb   :  { %145 = vmatprep.subr.mxu0 %v176_v0 }
   0xc   :  { %146 = vmatpush3.msra.mxu0 %v24_v6 }
   0xd   :  { %147 = vmatprep.subr.mxu0 %v176_v0 }
   0xe   :  { %148 = vmatpush3.msra.mxu0 %v23_v7 }
   0xf   :  { %149 = vmatprep.subr.mxu0 %v176_v0 }
  0x10   :  { %150 = vmatpush3.msra.mxu0 %v22_v8 }
  0x11   :  { %151 = vmatprep.subr.mxu0 %v176_v0 }
  0x12   :  { %152 = vmatpush3.msra.mxu0 %v21_v9 }
  0x13   :  { %153 = vmatprep.subr.mxu0 %v176_v0 }
  0x14   :  { %154 = vmatpush3.msra.mxu0 %v20_v10 }
  0x15   :  { %155 = vmatprep.subr.mxu0 %v176_v0 }
  0x16   :  { %156 = vmatpush3.msra.mxu0 %v19_v11 }
  0x17   :  { %157 = vmatprep.subr.mxu0 %v176_v0 }
  0x18   :  { %158 = vmatpush3.msra.mxu0 %v18_v12 }
  0x19   :  { %159 = vmatprep.subr.mxu0 %v176_v0 }
  0x1a   :  { %160 = vmatpush3.msra.mxu0 %v17_v13 }
  0x1b   :  { %161 = vmatprep.subr.mxu0 %v176_v0 }
  0x1c   :  { %162 = vmatpush3.msra.mxu0 %v16_v14 }
  0x1d   :  { %163 = vmatprep.subr.mxu0 %v176_v0 }
  0x1e   :  { %164 = vmatpush3.msra.mxu0 %v15_v15 }
  0x1f   :  { %165 = vmatprep.subr.mxu0 %v176_v0 }
  0x20   :  { %166 = vmatpush3.msra.mxu0 %v14_v16 }
  0x21   :  { %168 = vmatmul.mubr.f32.vlgmr.msra.gmra.mxu0 %v13_v17 }
  0xe1   :  { %v98_v19 = vpop.f32.mrf.mxu0 }
  0xe2   :  { %v99_v20 = vadd.f32 %v98_v19, %v31_v18 }
  0xe3   :  { %v169_v21 = vpop.f32.mrf.mxu0 }
  0xe4   :  { %v102_v22 = vand.u32 2147483647, %v99_v20  ;;  %vm109_vm2 = vcmp.ge.f32.partialorder %v99_v20, 0.0 }
  0xe6   :  { %v103_v23 = vsub.f32 0.0, %v102_v22 }
  0xe8   :  { %v104_v24 = vmul.f32 1.442695, %v103_v23 }
  0xea   :  { %172 = vpow2.f32 %v104_v24 }
  0xf7   :  { %v173_v25 = vpop.eup %172 }
  0xf8   :  { %v106_v26 = vadd.f32 1.0, %v173_v25 }
  0xfa   :  { %174 = vrcp.f32 %v106_v26 }
 0x107   :  { %v175_v27 = vpop.eup %174 }
 0x108   :  { %v108_v28 = vmul.f32 %v175_v27, %v173_v25 }
 0x10a   :  { %v110_v29 = vsub.f32 1.0, %v108_v28 }
 0x10c   :  { %v111_v30 = vsel %vm109_vm2, %v110_v29, %v108_v28 }
 0x10d   :  { %113 = vst.msk [vmem:[%s258_s3] sm:$0xff] %vm112_vm1, %v111_v30 }

</bundles_post_ra>
